<compile_context>
chip_gen: v7x
topology: tpu7x:2x2x1
jax: 0.10.0
libtpu: 0.0.40
codegen_flags: <defaults>
</compile_context>

<pallas_src>
import jax
import jax.numpy as jnp
from jax.experimental import pallas as pl
from jax.experimental.pallas import tpu as pltpu


def _round_up(x, m):
    return (x + m - 1) // m * m


# ---------------------------------------------------------------------------
# Kernel (built per (sample, learn_scale) config; unused refs never exist)
# ---------------------------------------------------------------------------
def _make_kernel(sample, learn_scale):
    def kernel(*refs):
        idx = 0
        z_mean_ref = refs[idx]; idx += 1
        if sample:
            z_std_ref = refs[idx]; eps_ref = refs[idx + 1]; idx += 2
        wm_ref = refs[idx]; bm_ref = refs[idx + 1]; idx += 2
        if learn_scale:
            ws_ref = refs[idx]; bs_ref = refs[idx + 1]; idx += 2
        mean_ref = refs[idx]; idx += 1
        if learn_scale:
            std_ref = refs[idx]

        if sample:
            # reparameterized sample: mean + std * eps  (VPU elementwise)
            z_vec = z_mean_ref[...] + z_std_ref[...] * eps_ref[...]
        else:
            z_vec = z_mean_ref[...]

        mean = jnp.dot(z_vec, wm_ref[...], preferred_element_type=jnp.float32)
        mean_ref[...] = (mean + bm_ref[...]).astype(mean_ref.dtype)
        if learn_scale:
            std = jnp.dot(z_vec, ws_ref[...], preferred_element_type=jnp.float32)
            std_ref[...] = (std + bs_ref[...]).astype(std_ref.dtype)

    return kernel


# ---------------------------------------------------------------------------
# Wrapper
# ---------------------------------------------------------------------------
def loss_decoder_project(z_mean, z_std, eps, params, *, sample, learn_scale,
                         tile_b=2048):
    """LossDecoder projection path as one pipelined Pallas call.

    Returns (mean, stddev) of the decoded independent multivariate normal.
    z_std / eps may be None when sample=False (they are neither read nor DMA'd).
    """
    B, D = z_mean.shape
    P = params["w_mean"].shape[1]

    # Largest sublane-aligned tile that still leaves >=2 grid steps when B > 8
    # (so both v7x TensorCores are used), bounded above by tile_b.
    TILE_B = max(8, min(tile_b, _round_up(pl.cdiv(B, 2), 8)))
    grid = (pl.cdiv(B, TILE_B),)

    z_spec = pl.BlockSpec((TILE_B, D), lambda i: (i, 0))
    w_spec = pl.BlockSpec((D, P), lambda i: (0, 0))        # VMEM-resident
    b_spec = pl.BlockSpec((1, P), lambda i: (0, 0))        # VMEM-resident
    o_spec = pl.BlockSpec((TILE_B, P), lambda i: (i, 0))

    args = [z_mean]
    in_specs = [z_spec]
    n_stream = 1
    if sample:
        args += [z_std, eps]
        in_specs += [z_spec, z_spec]
        n_stream = 3
    args += [params["w_mean"], params["b_mean"].reshape(1, P)]
    in_specs += [w_spec, b_spec]
    if learn_scale:
        args += [params["w_std"], params["b_std"].reshape(1, P)]
        in_specs += [w_spec, b_spec]

    n_out = 2 if learn_scale else 1
    if learn_scale:
        out_shape = (jax.ShapeDtypeStruct((B, P), jnp.float32),
                     jax.ShapeDtypeStruct((B, P), jnp.float32))
        out_specs = (o_spec, o_spec)
    else:
        out_shape = jax.ShapeDtypeStruct((B, P), jnp.float32)
        out_specs = o_spec

    # Free scheduling hint for XLA around the custom call.
    flops = 2 * B * D * P * n_out + (2 * B * D if sample else 0)
    bytes_accessed = 4 * (n_stream * B * D + n_out * (B * P + D * P + P))
    cost = pl.CostEstimate(flops=flops, transcendentals=0,
                           bytes_accessed=bytes_accessed)

    outs = pl.pallas_call(
        _make_kernel(sample, learn_scale),
        out_shape=out_shape,
        grid=grid,
        in_specs=in_specs,
        out_specs=out_specs,
        compiler_params=pltpu.CompilerParams(
            dimension_semantics=("parallel",),
        ),
        cost_estimate=cost,
    )(*args)

    if learn_scale:
        mean, std = outs
    else:
        mean = outs
        # ones_like_projection_dim(mean): free XLA broadcast, no kernel output
        # DMA stream wasted on a constant.
        std = jnp.ones((B, P), dtype=mean.dtype)
    # TODO(synk): the original module's host-sync assert
    # `torch.all(z_dist.stddev == 1.0)` for learn_scale=False is intentionally
    # not reproduced in the device hot path.
    return mean, std


# ---------------------------------------------------------------------------
# Pure-JAX reference + init
# ---------------------------------------------------------------------------
def _reference(z_mean, z_std, eps, params, *, sample, learn_scale):
    z_vec = z_mean + z_std * eps if sample else z_mean
    mean = z_vec @ params["w_mean"] + params["b_mean"]
    if learn_scale:
        std = z_vec @ params["w_std"] + params["b_std"]
    else:
        std = jnp.ones_like(mean)
    return mean, std


def init_params(key, representation_dim, projection_dim):
    """Deterministic nn.Linear-style init (weights pre-transposed to (D, P))."""
    k1, k2, k3, k4 = jax.random.split(key, 4)
    bound = 1.0 / jnp.sqrt(representation_dim)
    return {
        "w_mean": jax.random.uniform(k1, (representation_dim, projection_dim),
                                     jnp.float32, -bound, bound),
        "b_mean": jax.random.uniform(k2, (1, projection_dim),
                                     jnp.float32, -bound, bound),
        "w_std": jax.random.uniform(k3, (representation_dim, projection_dim),
                                    jnp.float32, -bound, bound),
        "b_std": jax.random.uniform(k4, (1, projection_dim),
                                    jnp.float32, -bound, bound),
    }


if __name__ == "__main__":
    REPR_DIM = 32           # representation_dim
    PROJ_DIM = 16           # projection_shape

    key = jax.random.PRNGKey(0)
    k_param, k_data = jax.random.split(key)
    params = init_params(k_param, REPR_DIM, PROJ_DIM)

    ok = True

    # --- Config 1: B=8, sample=True, learn_scale=True (rsample + learned std)
    B = 8
    k_zm, k_zs, k_eps = jax.random.split(k_data, 3)
    z_mean = jax.random.normal(k_zm, (B, REPR_DIM), jnp.float32)
    z_std = jax.nn.softplus(jax.random.normal(k_zs, (B, REPR_DIM), jnp.float32))
    eps = jax.random.normal(k_eps, (B, REPR_DIM), jnp.float32)

    mean1, std1 = loss_decoder_project(z_mean, z_std, eps, params,
                                       sample=True, learn_scale=True)
    jax.block_until_ready((mean1, std1))
    rm1, rs1 = _reference(z_mean, z_std, eps, params, sample=True, learn_scale=True)
    ok &= bool(jnp.allclose(mean1, rm1, atol=1e-5, rtol=1e-5))
    ok &= bool(jnp.allclose(std1, rs1, atol=1e-5, rtol=1e-5))
    assert mean1.shape == (B, PROJ_DIM) and std1.shape == (B, PROJ_DIM)

    # --- Config 2: B=8, sample=False, learn_scale=False (dist mean; std = ones)
    mean2, std2 = loss_decoder_project(z_mean, None, None, params,
                                       sample=False, learn_scale=False)
    jax.block_until_ready((mean2, std2))
    rm2, rs2 = _reference(z_mean, z_std, eps, params, sample=False, learn_scale=False)
    ok &= bool(jnp.allclose(mean2, rm2, atol=1e-5, rtol=1e-5))
    ok &= bool(jnp.allclose(std2, rs2, atol=1e-5, rtol=1e-5))
    assert mean2.shape == (B, PROJ_DIM) and std2.shape == (B, PROJ_DIM)

    # --- Config 3: ragged batch (B=20) exercising the masked boundary block
    #     and a >=2-step grid (both v7x TCs), sample=True, learn_scale=True.
    B3 = 20
    k_zm3, k_zs3, k_eps3 = jax.random.split(jax.random.PRNGKey(1), 3)
    z_mean3 = jax.random.normal(k_zm3, (B3, REPR_DIM), jnp.float32)
    z_std3 = jax.nn.softplus(jax.random.normal(k_zs3, (B3, REPR_DIM), jnp.float32))
    eps3 = jax.random.normal(k_eps3, (B3, REPR_DIM), jnp.float32)

    mean3, std3 = loss_decoder_project(z_mean3, z_std3, eps3, params,
                                       sample=True, learn_scale=True)
    jax.block_until_ready((mean3, std3))
    rm3, rs3 = _reference(z_mean3, z_std3, eps3, params, sample=True, learn_scale=True)
    ok &= bool(jnp.allclose(mean3, rm3, atol=1e-5, rtol=1e-5))
    ok &= bool(jnp.allclose(std3, rs3, atol=1e-5, rtol=1e-5))
    assert mean3.shape == (B3, PROJ_DIM) and std3.shape == (B3, PROJ_DIM)

    if ok:
        print("KERNEL_OK")
    else:
        raise SystemExit("mismatch vs reference")
</pallas_src>

<mosaic_0001>
module attributes {stable_mosaic.version = 11 : i64} {
  func.func @kernel(%arg0: i32, %arg1: memref<8x32xf32, #tpu.memory_space<vmem>>, %arg2: memref<8x32xf32, #tpu.memory_space<vmem>>, %arg3: memref<8x32xf32, #tpu.memory_space<vmem>>, %arg4: memref<32x16xf32, #tpu.memory_space<vmem>>, %arg5: memref<1x16xf32, #tpu.memory_space<vmem>>, %arg6: memref<32x16xf32, #tpu.memory_space<vmem>>, %arg7: memref<1x16xf32, #tpu.memory_space<vmem>>, %arg8: memref<8x16xf32, #tpu.memory_space<vmem>>, %arg9: memref<8x16xf32, #tpu.memory_space<vmem>>) attributes {dimension_semantics = [#tpu.dimension_semantics<parallel>], iteration_bounds = array<i64: 1>, scalar_prefetch = 0 : i64, scratch_operands = 0 : i64, tpu.core_type = #tpu.core_type<tc>, window_params = [{transform_indices = @transform_0, window_bounds = array<i64: 8, 32>}, {transform_indices = @transform_1, window_bounds = array<i64: 8, 32>}, {transform_indices = @transform_2, window_bounds = array<i64: 8, 32>}, {pipeline_mode = #tpu.pipeline_mode<synchronous>, transform_indices = @transform_3, window_bounds = array<i64: 32, 16>}, {pipeline_mode = #tpu.pipeline_mode<synchronous>, transform_indices = @transform_4, window_bounds = array<i64: 1, 16>}, {pipeline_mode = #tpu.pipeline_mode<synchronous>, transform_indices = @transform_5, window_bounds = array<i64: 32, 16>}, {pipeline_mode = #tpu.pipeline_mode<synchronous>, transform_indices = @transform_6, window_bounds = array<i64: 1, 16>}, {transform_indices = @transform_7, window_bounds = array<i64: 8, 16>}, {transform_indices = @transform_8, window_bounds = array<i64: 8, 16>}]} {
    %c0 = arith.constant 0 : index
    %c0_0 = arith.constant 0 : index
    %0 = vector.load %arg1[%c0, %c0_0] : memref<8x32xf32, #tpu.memory_space<vmem>>, vector<8x32xf32>
    %c0_1 = arith.constant 0 : index
    %c0_2 = arith.constant 0 : index
    %1 = vector.load %arg2[%c0_1, %c0_2] : memref<8x32xf32, #tpu.memory_space<vmem>>, vector<8x32xf32>
    %c0_3 = arith.constant 0 : index
    %c0_4 = arith.constant 0 : index
    %2 = vector.load %arg3[%c0_3, %c0_4] : memref<8x32xf32, #tpu.memory_space<vmem>>, vector<8x32xf32>
    %3 = arith.mulf %1, %2 : vector<8x32xf32>
    %4 = arith.addf %0, %3 : vector<8x32xf32>
    %c0_5 = arith.constant 0 : index
    %c0_6 = arith.constant 0 : index
    %5 = vector.load %arg4[%c0_5, %c0_6] : memref<32x16xf32, #tpu.memory_space<vmem>>, vector<32x16xf32>
    %cst = arith.constant dense<0.000000e+00> : vector<8x16xf32>
    %6 = tpu.matmul %4, %5, %cst {dimension_numbers = #tpu.dot_dimension_numbers<[1], [0], [0], [1], [0, 0, 1, 1], [], []>} : vector<8x32xf32>, vector<32x16xf32>, vector<8x16xf32> -> vector<8x16xf32>
    %c0_7 = arith.constant 0 : index
    %c0_8 = arith.constant 0 : index
    %7 = vector.load %arg5[%c0_7, %c0_8] : memref<1x16xf32, #tpu.memory_space<vmem>>, vector<1x16xf32>
    %8 = vector.broadcast %7 : vector<1x16xf32> to vector<8x16xf32>
    %9 = arith.addf %6, %8 : vector<8x16xf32>
    %c0_9 = arith.constant 0 : index
    %c0_10 = arith.constant 0 : index
    %10 = vector.load %arg8[%c0_9, %c0_10] : memref<8x16xf32, #tpu.memory_space<vmem>>, vector<8x16xf32>
    tpu.vector_store %arg8[%c0_9, %c0_10], %9 {strides = array<i32>} : memref<8x16xf32, #tpu.memory_space<vmem>>, vector<8x16xf32>,
    %c0_11 = arith.constant 0 : index
    %c0_12 = arith.constant 0 : index
    %11 = vector.load %arg6[%c0_11, %c0_12] : memref<32x16xf32, #tpu.memory_space<vmem>>, vector<32x16xf32>
    %cst_13 = arith.constant dense<0.000000e+00> : vector<8x16xf32>
    %12 = tpu.matmul %4, %11, %cst_13 {dimension_numbers = #tpu.dot_dimension_numbers<[1], [0], [0], [1], [0, 0, 1, 1], [], []>} : vector<8x32xf32>, vector<32x16xf32>, vector<8x16xf32> -> vector<8x16xf32>
    %c0_14 = arith.constant 0 : index
    %c0_15 = arith.constant 0 : index
    %13 = vector.load %arg7[%c0_14, %c0_15] : memref<1x16xf32, #tpu.memory_space<vmem>>, vector<1x16xf32>
    %14 = vector.broadcast %13 : vector<1x16xf32> to vector<8x16xf32>
    %15 = arith.addf %12, %14 : vector<8x16xf32>
    %c0_16 = arith.constant 0 : index
    %c0_17 = arith.constant 0 : index
    %16 = vector.load %arg9[%c0_16, %c0_17] : memref<8x16xf32, #tpu.memory_space<vmem>>, vector<8x16xf32>
    tpu.vector_store %arg9[%c0_16, %c0_17], %15 {strides = array<i32>} : memref<8x16xf32, #tpu.memory_space<vmem>>, vector<8x16xf32>,
    return
  }
  func.func @transform_0(%arg0: i32) -> (i32, i32) {
    %c0_i32 = arith.constant 0 : i32
    %c0_i32_0 = arith.constant 0 : i32
    return %arg0, %c0_i32 : i32, i32
  }
  func.func @transform_1(%arg0: i32) -> (i32, i32) {
    %c0_i32 = arith.constant 0 : i32
    %c0_i32_0 = arith.constant 0 : i32
    return %arg0, %c0_i32 : i32, i32
  }
  func.func @transform_2(%arg0: i32) -> (i32, i32) {
    %c0_i32 = arith.constant 0 : i32
    %c0_i32_0 = arith.constant 0 : i32
    return %arg0, %c0_i32 : i32, i32
  }
  func.func @transform_3(%arg0: i32) -> (i32, i32) {
    %c0_i32 = arith.constant 0 : i32
    %c0_i32_0 = arith.constant 0 : i32
    %c0_i32_1 = arith.constant 0 : i32
    return %c0_i32, %c0_i32_0 : i32, i32
  }
  func.func @transform_4(%arg0: i32) -> (i32, i32) {
    %c0_i32 = arith.constant 0 : i32
    %c0_i32_0 = arith.constant 0 : i32
    %c0_i32_1 = arith.constant 0 : i32
    return %c0_i32, %c0_i32_0 : i32, i32
  }
  func.func @transform_5(%arg0: i32) -> (i32, i32) {
    %c0_i32 = arith.constant 0 : i32
    %c0_i32_0 = arith.constant 0 : i32
    %c0_i32_1 = arith.constant 0 : i32
    return %c0_i32, %c0_i32_0 : i32, i32
  }
  func.func @transform_6(%arg0: i32) -> (i32, i32) {
    %c0_i32 = arith.constant 0 : i32
    %c0_i32_0 = arith.constant 0 : i32
    %c0_i32_1 = arith.constant 0 : i32
    return %c0_i32, %c0_i32_0 : i32, i32
  }
  func.func @transform_7(%arg0: i32) -> (i32, i32) {
    %c0_i32 = arith.constant 0 : i32
    %c0_i32_0 = arith.constant 0 : i32
    return %arg0, %c0_i32 : i32, i32
  }
  func.func @transform_8(%arg0: i32) -> (i32, i32) {
    %c0_i32 = arith.constant 0 : i32
    %c0_i32_0 = arith.constant 0 : i32
    return %arg0, %c0_i32 : i32, i32
  }
}

</mosaic_0001>

<bundles_post_ra>
// kernel: tpu_custom_call.1
= control target key start
LH: loop header
LB: loop body
LE: loop exit
PB: predicated region body
PF: predicated region fallthrough
CT: control target
= control target key end

     0   :  { %14 = vsyncpa [#allocation3], 0  ;;  %v333_v3 = vmov 0.0|0.0   ;;  %vm334_vm0 = vmmov 0   ;;  %v335_v11 = vmov 0.0   ;;  %s448_s0 = inlined_call_operand.vmem [shape: f32[8,32], index: 0, kind: input, shape index: {}]   ;;  %s449_s1 = inlined_call_operand.vmem [shape: f32[8,32], index: 1, kind: input, shape index: {}]   ;;  %s450_s2 = inlined_call_operand.vmem [shape: f32[8,32], index: 2, kind: input, shape index: {}]   ;;  %s451_s3 = inlined_call_operand.vmem [shape: f32[32,16], index: 3, kind: input, shape index: {}]   ;;  %s452_s4 = inlined_call_operand.vmem [shape: f32[1,16], index: 4, kind: input, shape index: {}]   ;;  %s453_s5 = inlined_call_operand.vmem [shape: f32[32,16], index: 5, kind: input, shape index: {}]   ;;  %s454_s6 = inlined_call_operand.vmem [shape: f32[1,16], index: 6, kind: input, shape index: {}]   ;;  %s455_s7 = inlined_call_operand.hbm [shape: f32[8,16], index: 7, kind: output, shape index: {0}]   ;;  %s456_s8 = inlined_call_operand.hbm [shape: f32[8,16], index: 8, kind: output, shape index: {1}]  }
   0x1   :  { %v35_v0 = vld [vmem:[%s451_s3] sm:$0xff]  ;;  %v36_v1 = vld [vmem:[%s451_s3 + $0x8] sm:$0xff]  ;;  %268 = vmatprep.subr.bf16.mxu0 %v333_v3  ;;  %274 = vmatprep.subr.bf16.mxu1 %v333_v3  ;;  %v37_v6 = vld [vmem:[%s451_s3 + $0x10] sm:$0xff] }
   0x2   :  { %v122_v2 = vld [vmem:[%s453_s5] sm:$0xff]  ;;  %v269_v4 = vpack.c.bf16 %v36_v1, %v35_v0  ;;  %v123_v5 = vld [vmem:[%s453_s5 + $0x8] sm:$0xff]  ;;  %v38_v7 = vld [vmem:[%s451_s3 + $0x18] sm:$0xff]  ;;  %254 = vmatprep.mubr.msk.f32.mxu0 %vm334_vm0, %v335_v11  ;;  %265 = vmatprep.mubr.msk.f32.mxu1 %vm334_vm0, %v335_v11 }
   0x3   :  { %v275_v8 = vpack.c.bf16 %v123_v5, %v122_v2  ;;  %v124_v9 = vld [vmem:[%s453_s5 + $0x10] sm:$0xff]  ;;  %v125_v10 = vld [vmem:[%s453_s5 + $0x18] sm:$0xff]  ;;  %v272_v12 = vpack.c.bf16 %v38_v7, %v37_v6  ;;  %v30_v13 = vld [vmem:[%s448_s0] sm:$0xff] }
   0x4   :  { %270 = vmatpush3.bf16.msra.mxu0 %v269_v4  ;;  %v31_v14 = vld [vmem:[%s449_s1] sm:$0xff]  ;;  %v278_v16 = vpack.c.bf16 %v125_v10, %v124_v9 }
   0x5   :  { %v32_v15 = vld [vmem:[%s450_s2] sm:$0xff]  ;;  %276 = vmatpush3.bf16.msra.mxu1 %v275_v8  ;;  %271 = vmatprep.subr.bf16.mxu0 %v333_v3 }
   0x6   :  { %v33_v17 = vmul.f32 %v32_v15, %v31_v14 }
   0x7   :  { %15 = vsyncpa [#allocation5], 0  ;;  %277 = vmatprep.subr.bf16.mxu1 %v333_v3  ;;  %vm46_vm1 = vcmask 261120   ;;  %v232_v19 = vld [vmem:[%s452_s4] ss:$0 sm:$0xff]  ;;  %s336_s1 = smov [#allocation2]  }
   0x8   :  { %v34_v18 = vadd.f32 %v33_v17, %v30_v13  ;;  %273 = vmatpush3.bf16.msra.mxu0 %v272_v12  ;;  %s210_s26 = sshll.u32 %s336_s1, 4  ;;  %v234_v20 = vld [vmem:[%s454_s6] ss:$0 sm:$0xff]  ;;  %s337_s28 = smov [#allocation4]   ;;  %vm120_vm2 = vcmask 130048   ;;  %s211_s26 = int_to_ptr.vmem [resolvable:$true] %s210_s26 }
   0x9   :  { %279 = vmatpush3.bf16.msra.mxu1 %v278_v16  ;;  %s220_s29 = sshll.u32 %s337_s28, 4  ;;  %s285_s4 = scalar_lea.vmem %s211_s26, 128  ;;  %s221_s29 = int_to_ptr.vmem [resolvable:$true] %s220_s29 }
   0xa   :  { %p286_p0 = scmp.ne.s32.totalorder %s211_s26, %s285_s4  ;;  %p290_p1 = scmp.lt.s32.totalorder %s211_s26, %s211_s26 }
   0xb   :  { %255 = vmatmul.mubr.msk.f32.vlgmr.msra.gmra.mrb[0].mxu0 %vm46_vm1, %v34_v18  ;;  %p291_p2 = scmp.lt.s32.totalorder %s285_s4, %s285_s4 }
   0xc   :  { %266 = vmatmul.mubr.msk.f32.vlgmr.msra.gmra.mrb[0].mxu1 %vm46_vm1, %v34_v18 }
   0xd   :  { %p292_p3 = por %p291_p2, %p290_p1 }
   0xf   :  { %p293_p4 = pnand %p292_p3, %p286_p0 }
  0xde   :  { %v116_v21 = vpop.f32.mrb[0].mxu0 }
  0xdf   :  { %v117_v22 = vadd.f32 %v232_v19, %v116_v21  ;;  %v199_v23 = vpop.f32.mrb[0].mxu1  ;;  %v256_v24 = vpop.f32.mrb[1].mxu0 }
  0xe0   :  { %v200_v25 = vadd.f32 %v234_v20, %v199_v23  ;;  %v267_v26 = vpop.f32.mrb[1].mxu1 }
  0xe1   :  { %121 = vst.msk [vmem:[#allocation2] sm:$0xff] %vm120_vm2, %v117_v22 }
  0xe2   :  { %296 = shalt.err (!%p293_p4)
}
  0xe3   :  { %s297_s9 = scalar_lea.hbm %s455_s7, 128 }
  0xe4   :  { %p298_p5 = scmp.ne.s32.totalorder %s455_s7, %s297_s9  ;;  %p301_p6 = scmp.lt.u32.totalorder %s297_s9, %s455_s7 }
  0xe6   :  { %p303_p7 = pnand %p301_p6, %p298_p5 }
  0xe8   :  { %306 = shalt.err (!%p303_p7)
}
  0xe9   :  { %213 = dma.vmem_to_hbm [thread:$0]  %s211_s26, 128, %s455_s7, [#allocation3]   ;;  %203 = vst.msk [vmem:[#allocation4] sm:$0xff] %vm120_vm2, %v200_v25 }
  0xea   :  { %s307_s16 = scalar_lea.vmem %s221_s29, 128  ;;  %p312_p9 = scmp.lt.s32.totalorder %s221_s29, %s221_s29 }
  0xeb   :  { %p308_p8 = scmp.ne.s32.totalorder %s221_s29, %s307_s16  ;;  %p313_p10 = scmp.lt.s32.totalorder %s307_s16, %s307_s16 }
  0xed   :  { %p314_p11 = por %p313_p10, %p312_p9 }
  0xef   :  { %p315_p12 = pnand %p314_p11, %p308_p8 }
  0xf1   :  { %318 = shalt.err (!%p315_p12)
}
  0xf2   :  { %s319_s19 = scalar_lea.hbm %s456_s8, 128 }
  0xf3   :  { %p320_p13 = scmp.ne.s32.totalorder %s456_s8, %s319_s19  ;;  %p323_p0 = scmp.lt.u32.totalorder %s319_s19, %s456_s8 }
  0xf5   :  { %p325_p1 = pnand %p323_p0, %p320_p13 }
  0xf7   :  { %328 = shalt.err (!%p325_p1)
}
  0xf8   :  { %223 = dma.vmem_to_hbm [thread:$0]  %s221_s29, 128, %s456_s8, [#allocation5]  }
  0xf9   :  { %329 = dma.done.wait [#allocation3], 128  }
  0xfa   :  { %330 = vsyncadd [#allocation3], 4294967168 }
  0xfb   :  { %331 = dma.done.wait [#allocation5], 128  }
  0xfc   :  { %332 = vsyncadd [#allocation5], 4294967168 }
  0xfd   :  { %230 = vsyncpa [#allocation3], 1 }
  0xfe   :  { %231 = vsyncpa [#allocation5], 1 }

</bundles_post_ra>
